<compile_context>
chip_gen: v6e
topology: v6e:2x2x1
jax: 0.10.0
libtpu: 0.0.40
codegen_flags: <defaults>
</compile_context>

<pallas_src>
import math

import jax
import jax.numpy as jnp
from jax.experimental import pallas as pl
from jax.experimental.pallas import tpu as pltpu

EPS = 1e-5       # PyTorch LayerNorm default eps
LANE = 128       # lane width
MAX_SUB = 2048   # max sublanes per tile -> 2048*128*4B = 1 MiB per f32 block


def layernorm_pair_kernel(wb_ref, x0_ref, x1_ref, y0_ref, y1_ref):
    # wb_ref: SMEM f32[4] = [w0, w1, b0, b1]
    # x0_ref/x1_ref/y0_ref/y1_ref: (tm, 128) lane-dense tiles
    w0 = wb_ref[0]
    w1 = wb_ref[1]
    b0 = wb_ref[2]
    b1 = wb_ref[3]

    x0 = x0_ref[...].astype(jnp.float32)
    x1 = x1_ref[...].astype(jnp.float32)

    # For a pair (x0, x1): mean = (x0+x1)/2, centered x0 = (x0-x1)/2, centered x1 = -(x0-x1)/2,
    # biased variance = ((xc0)^2 + (xc1)^2)/2 = xc0^2.
    xc0 = 0.5 * (x0 - x1)
    inv = jax.lax.rsqrt(xc0 * xc0 + EPS)
    t = xc0 * inv                      # normalized x0; normalized x1 = -t

    y0_ref[...] = (t * w0 + b0).astype(y0_ref.dtype)
    y1_ref[...] = (b1 - t * w1).astype(y1_ref.dtype)


def layer_norm(x, weight, bias):
    """LayerNorm over the last dim (size 2) of x, with elementwise affine."""
    orig_shape = x.shape
    F = orig_shape[-1]
    assert F == 2, "this kernel specializes LayerNorm(normalized_shape=2)"
    rows = math.prod(orig_shape[:-1])

    # --- choose a lane-dense tiling: slabs of shape (S, 128), tiled by tm sublanes ---
    sub_needed = -(-rows // LANE)                       # cdiv(rows, 128)
    tm = min(MAX_SUB, ((sub_needed + 7) // 8) * 8)      # multiple of 8 sublanes
    n_blocks = -(-sub_needed // tm)
    S = n_blocks * tm
    rows_pad = S * LANE

    # --- deinterleave the feature pair and pad to the tile ---
    x2 = x.reshape(rows, F)
    x0 = x2[:, 0]
    x1 = x2[:, 1]
    pad = rows_pad - rows
    if pad:
        x0 = jnp.pad(x0, (0, pad))
        x1 = jnp.pad(x1, (0, pad))
    x0 = x0.reshape(S, LANE)
    x1 = x1.reshape(S, LANE)

    # weight/bias as SMEM scalars: [w0, w1, b0, b1]
    wb = jnp.concatenate(
        [weight.reshape(-1).astype(jnp.float32), bias.reshape(-1).astype(jnp.float32)]
    )

    tile_spec = pl.BlockSpec((tm, LANE), lambda i: (i, 0))

    y0, y1 = pl.pallas_call(
        layernorm_pair_kernel,
        out_shape=(
            jax.ShapeDtypeStruct((S, LANE), x.dtype),
            jax.ShapeDtypeStruct((S, LANE), x.dtype),
        ),
        grid_spec=pltpu.PrefetchScalarGridSpec(
            num_scalar_prefetch=0,
            grid=(n_blocks,),
            in_specs=[
                pl.BlockSpec(memory_space=pltpu.MemorySpace.SMEM),  # wb scalars
                tile_spec,                                          # x0 slab
                tile_spec,                                          # x1 slab
            ],
            out_specs=[tile_spec, tile_spec],
        ),
        compiler_params=pltpu.CompilerParams(
            dimension_semantics=("parallel",),  # shards the row grid across v7x TCs
        ),
    )(wb, x0, x1)

    # --- re-interleave the feature pair and drop padding ---
    y0 = y0.reshape(rows_pad)[:rows]
    y1 = y1.reshape(rows_pad)[:rows]
    y = jnp.stack([y0, y1], axis=-1)
    return y.reshape(orig_shape)


if __name__ == "__main__":
    key = jax.random.PRNGKey(0)
    # Small shape consistent with LayerNorm(2): (B, C, H, F=2)
    x = jax.random.normal(key, (2, 4, 16, 2), dtype=jnp.float32)

    # PyTorch nn.LayerNorm default init: weight = ones, bias = zeros
    weight = jnp.ones((2,), dtype=jnp.float32)
    bias = jnp.zeros((2,), dtype=jnp.float32)

    y = layer_norm(x, weight, bias)
    y = jax.block_until_ready(y)

    # Pure-JAX reference check (biased variance, eps inside sqrt — PyTorch LN semantics)
    mean = jnp.mean(x, axis=-1, keepdims=True)
    var = jnp.mean((x - mean) ** 2, axis=-1, keepdims=True)
    ref = (x - mean) / jnp.sqrt(var + EPS) * weight + bias
    assert jnp.allclose(y, ref, atol=1e-5, rtol=1e-5), "mismatch vs reference"

    print("KERNEL_OK")
</pallas_src>

<mosaic_0001>
module attributes {stable_mosaic.version = 11 : i64} {
  func.func @layernorm_pair_kernel(%arg0: i32, %arg1: memref<4xf32, #tpu.memory_space<smem>>, %arg2: memref<8x128xf32, #tpu.memory_space<vmem>>, %arg3: memref<8x128xf32, #tpu.memory_space<vmem>>, %arg4: memref<8x128xf32, #tpu.memory_space<vmem>>, %arg5: memref<8x128xf32, #tpu.memory_space<vmem>>) attributes {dimension_semantics = [#tpu.dimension_semantics<parallel>], iteration_bounds = array<i64: 1>, scalar_prefetch = 0 : i64, scratch_operands = 0 : i64, tpu.core_type = #tpu.core_type<tc>, window_params = [{transform_indices = @transform_0, window_bounds = array<i64: 4>}, {transform_indices = @transform_1, window_bounds = array<i64: 8, 128>}, {transform_indices = @transform_2, window_bounds = array<i64: 8, 128>}, {transform_indices = @transform_3, window_bounds = array<i64: 8, 128>}, {transform_indices = @transform_4, window_bounds = array<i64: 8, 128>}]} {
    %c0 = arith.constant 0 : index
    %0 = memref.load %arg1[%c0] : memref<4xf32, #tpu.memory_space<smem>>
    %c1 = arith.constant 1 : index
    %1 = memref.load %arg1[%c1] : memref<4xf32, #tpu.memory_space<smem>>
    %c2 = arith.constant 2 : index
    %2 = memref.load %arg1[%c2] : memref<4xf32, #tpu.memory_space<smem>>
    %c3 = arith.constant 3 : index
    %3 = memref.load %arg1[%c3] : memref<4xf32, #tpu.memory_space<smem>>
    %c0_0 = arith.constant 0 : index
    %c0_1 = arith.constant 0 : index
    %4 = vector.load %arg2[%c0_0, %c0_1] : memref<8x128xf32, #tpu.memory_space<vmem>>, vector<8x128xf32>
    %c0_2 = arith.constant 0 : index
    %c0_3 = arith.constant 0 : index
    %5 = vector.load %arg3[%c0_2, %c0_3] : memref<8x128xf32, #tpu.memory_space<vmem>>, vector<8x128xf32>
    %6 = arith.subf %4, %5 : vector<8x128xf32>
    %cst = arith.constant 5.000000e-01 : f32
    %7 = vector.broadcast %cst : f32 to vector<8x128xf32>
    %8 = arith.mulf %7, %6 : vector<8x128xf32>
    %9 = arith.mulf %8, %8 : vector<8x128xf32>
    %cst_4 = arith.constant 9.99999974E-6 : f32
    %10 = vector.broadcast %cst_4 : f32 to vector<8x128xf32>
    %11 = arith.addf %9, %10 : vector<8x128xf32>
    %12 = math.rsqrt %11 : vector<8x128xf32>
    %13 = arith.mulf %8, %12 : vector<8x128xf32>
    %14 = vector.broadcast %0 : f32 to vector<8x128xf32>
    %15 = arith.mulf %13, %14 : vector<8x128xf32>
    %16 = vector.broadcast %2 : f32 to vector<8x128xf32>
    %17 = arith.addf %15, %16 : vector<8x128xf32>
    %c0_5 = arith.constant 0 : index
    %c0_6 = arith.constant 0 : index
    %18 = vector.load %arg4[%c0_5, %c0_6] : memref<8x128xf32, #tpu.memory_space<vmem>>, vector<8x128xf32>
    tpu.vector_store %arg4[%c0_5, %c0_6], %17 {strides = array<i32>} : memref<8x128xf32, #tpu.memory_space<vmem>>, vector<8x128xf32>,
    %19 = vector.broadcast %1 : f32 to vector<8x128xf32>
    %20 = arith.mulf %13, %19 : vector<8x128xf32>
    %21 = vector.broadcast %3 : f32 to vector<8x128xf32>
    %22 = arith.subf %21, %20 : vector<8x128xf32>
    %c0_7 = arith.constant 0 : index
    %c0_8 = arith.constant 0 : index
    %23 = vector.load %arg5[%c0_7, %c0_8] : memref<8x128xf32, #tpu.memory_space<vmem>>, vector<8x128xf32>
    tpu.vector_store %arg5[%c0_7, %c0_8], %22 {strides = array<i32>} : memref<8x128xf32, #tpu.memory_space<vmem>>, vector<8x128xf32>,
    return
  }
  func.func @transform_0(%arg0: i32) -> i32 {
    %c0_i32 = arith.constant 0 : i32
    %c0_i32_0 = arith.constant 0 : i32
    return %c0_i32 : i32
  }
  func.func @transform_1(%arg0: i32) -> (i32, i32) {
    %c0_i32 = arith.constant 0 : i32
    %c0_i32_0 = arith.constant 0 : i32
    return %arg0, %c0_i32 : i32, i32
  }
  func.func @transform_2(%arg0: i32) -> (i32, i32) {
    %c0_i32 = arith.constant 0 : i32
    %c0_i32_0 = arith.constant 0 : i32
    return %arg0, %c0_i32 : i32, i32
  }
  func.func @transform_3(%arg0: i32) -> (i32, i32) {
    %c0_i32 = arith.constant 0 : i32
    %c0_i32_0 = arith.constant 0 : i32
    return %arg0, %c0_i32 : i32, i32
  }
  func.func @transform_4(%arg0: i32) -> (i32, i32) {
    %c0_i32 = arith.constant 0 : i32
    %c0_i32_0 = arith.constant 0 : i32
    return %arg0, %c0_i32 : i32, i32
  }
}

</mosaic_0001>

<bundles_post_ra>
// kernel: tpu_custom_call.1
= control target key start
LH: loop header
LB: loop body
LE: loop exit
PB: predicated region body
PF: predicated region fallthrough
CT: control target
= control target key end

     0   :  { %10 = vsyncpa [#allocation5], 0  ;;  %s259_s0 = inlined_call_operand.hbm [shape: f32[4], index: 0, kind: input, shape index: {}]   ;;  %s260_s1 = inlined_call_operand.hbm [shape: f32[8,128], index: 1, kind: input, shape index: {}]   ;;  %s261_s2 = inlined_call_operand.hbm [shape: f32[8,128], index: 2, kind: input, shape index: {}]   ;;  %s262_s3 = inlined_call_operand.hbm [shape: f32[8,128], index: 3, kind: output, shape index: {0}]   ;;  %s263_s4 = inlined_call_operand.hbm [shape: f32[8,128], index: 4, kind: output, shape index: {1}]  }
   0x1   :  { %11 = vsyncpa [#allocation3], 0 }
   0x2   :  { %12 = vsyncpa [#allocation8], 0 }
   0x3   :  { %13 = vsyncpa [#allocation4], 0 }
   0x4   :  { %14 = vsyncpa [#allocation11], 0  ;;  %s214_s15 = smov [#allocation2]   ;;  %s215_s18 = smov [#allocation6]  }
   0x5   :  { %22 = dma.hbm_to_smem %s259_s0, 16, %s214_s15, [#allocation5]  }
   0x6   :  { %s29_s19 = sshll.u32 %s215_s18, 4  ;;  %s216_s20 = smov [#allocation7]   ;;  %s30_s19 = int_to_ptr.vmem [resolvable:$true] %s29_s19 }
   0x7   :  { %s39_s21 = sshll.u32 %s216_s20, 4  ;;  %s132_s22 = scalar_lea.vmem %s30_s19, 128  ;;  %s40_s21 = int_to_ptr.vmem [resolvable:$true] %s39_s21 }
   0x8   :  { %p133_p0 = scmp.ne.s32.totalorder %s30_s19, %s132_s22  ;;  %p137_p1 = scmp.lt.s32.totalorder %s30_s19, %s30_s19 }
   0x9   :  { %p138_p2 = scmp.lt.s32.totalorder %s132_s22, %s132_s22 }
   0xb   :  { %p139_p3 = por %p138_p2, %p137_p1 }
   0xd   :  { %p140_p4 = pnand %p139_p3, %p133_p0 }
   0xf   :  { %143 = shalt.err (!%p140_p4)
}
  0x10   :  { %32 = dma.hbm_to_vmem [thread:$0]  %s260_s1, 128, %s30_s19, [#allocation3]  }
  0x11   :  { %s152_s25 = scalar_lea.vmem %s40_s21, 128  ;;  %p157_p6 = scmp.lt.s32.totalorder %s40_s21, %s40_s21 }
  0x12   :  { %p153_p5 = scmp.ne.s32.totalorder %s40_s21, %s152_s25  ;;  %p158_p7 = scmp.lt.s32.totalorder %s152_s25, %s152_s25 }
  0x14   :  { %p159_p8 = por %p158_p7, %p157_p6 }
  0x16   :  { %p160_p9 = pnand %p159_p8, %p153_p5 }
  0x18   :  { %163 = shalt.err (!%p160_p9)
}
  0x19   :  { %42 = dma.hbm_to_vmem [thread:$0]  %s261_s2, 128, %s40_s21, [#allocation8]  }
  0x1a   :  { %204 = dma.done.wait [#allocation5], 16  }
  0x1b   :  { %205 = vsyncadd [#allocation5], 4294967280 }
  0x1c   :  { %206 = dma.done.wait [#allocation3], 128  }
  0x1d   :  { %207 = vsyncadd [#allocation3], 4294967168 }
  0x1e   :  { %208 = dma.done.wait [#allocation8], 128  }
  0x1f   :  { %209 = vsyncadd [#allocation8], 4294967168 }
  0x20   :  { %52 = sfence }
  0x21   :  { %v57_v0 = vld [vmem:[#allocation6] sm:$0xff]  ;;  %v58_v1 = vld [vmem:[#allocation7] sm:$0xff]  ;;  %s53_s1 = sld [smem:[#allocation2]]  ;;  %s217_s2 = smov [#allocation9]  }
  0x22   :  { %v59_v2 = vsub.f32 %v57_v0, %v58_v1  ;;  %s106_s27 = sld [smem:[#allocation2 + $0x1]]  ;;  %s81_s30 = sshll.u32 %s217_s2, 4  ;;  %s82_s30 = int_to_ptr.vmem [resolvable:$true] %s81_s30 }
  0x23   :  { %s107_s28 = sld [smem:[#allocation2 + $0x2]]  ;;  %s218_s5 = smov [#allocation10]  }
  0x24   :  { %v60_v3 = vmul.f32 0.5, %v59_v2  ;;  %s108_s29 = sld [smem:[#allocation2 + $0x3]]  ;;  %s91_s6 = sshll.u32 %s218_s5, 4  ;;  %s92_s6 = int_to_ptr.vmem [resolvable:$true] %s91_s6 }
  0x25   :  { %s164_s7 = scalar_lea.vmem %s82_s30, 128  ;;  %p169_p11 = scmp.lt.s32.totalorder %s82_s30, %s82_s30 }
  0x26   :  { %v61_v4 = vmul.f32 %v60_v3, %v60_v3  ;;  %p165_p10 = scmp.ne.s32.totalorder %s82_s30, %s164_s7  ;;  %p170_p12 = scmp.lt.s32.totalorder %s164_s7, %s164_s7 }
  0x27   :  { %v65_v7 = vstv %s53_s1 }
  0x28   :  { %v62_v5 = vadd.f32 1e-05, %v61_v4  ;;  %v70_v8 = vstv %s106_s27  ;;  %p171_p13 = por %p170_p12, %p169_p11 }
  0x29   :  { %v67_v10 = vstv %s107_s28 }
  0x2a   :  { %114 = vrsqrt.f32 %v62_v5  ;;  %v72_v11 = vstv %s108_s29  ;;  %p172_p0 = pnand %p171_p13, %p165_p10 }
  0x37   :  { %v115_v6 = vpop.eup %114 }
  0x38   :  { %v64_v9 = vmul.f32 %v115_v6, %v60_v3 }
  0x3a   :  { %v66_v12 = vmul.f32 %v65_v7, %v64_v9  ;;  %v71_v13 = vmul.f32 %v70_v8, %v64_v9 }
  0x3c   :  { %v68_v14 = vadd.f32 %v67_v10, %v66_v12  ;;  %v73_v15 = vsub.f32 %v72_v11, %v71_v13 }
  0x3e   :  { %69 = vst [vmem:[#allocation9] sm:$0xff] %v68_v14  ;;  %74 = vst [vmem:[#allocation10] sm:$0xff] %v73_v15 }
  0x3f   :  { %175 = shalt.err (!%p172_p0)
}
  0x40   :  { %84 = dma.vmem_to_hbm [thread:$0]  %s82_s30, 128, %s262_s3, [#allocation4]  }
  0x41   :  { %s184_s10 = scalar_lea.vmem %s92_s6, 128  ;;  %p189_p2 = scmp.lt.s32.totalorder %s92_s6, %s92_s6 }
  0x42   :  { %p185_p1 = scmp.ne.s32.totalorder %s92_s6, %s184_s10  ;;  %p190_p3 = scmp.lt.s32.totalorder %s184_s10, %s184_s10 }
  0x44   :  { %p191_p4 = por %p190_p3, %p189_p2 }
  0x46   :  { %p192_p5 = pnand %p191_p4, %p185_p1 }
  0x48   :  { %195 = shalt.err (!%p192_p5)
}
  0x49   :  { %94 = dma.vmem_to_hbm [thread:$0]  %s92_s6, 128, %s263_s4, [#allocation11]  }
  0x4a   :  { %210 = dma.done.wait [#allocation4], 128  }
  0x4b   :  { %211 = vsyncadd [#allocation4], 4294967168 }
  0x4c   :  { %212 = dma.done.wait [#allocation11], 128  }
  0x4d   :  { %213 = vsyncadd [#allocation11], 4294967168 }
  0x4e   :  { %101 = vsyncpa [#allocation3], 1 }
  0x4f   :  { %102 = vsyncpa [#allocation8], 1 }
  0x50   :  { %103 = vsyncpa [#allocation4], 1 }
  0x51   :  { %104 = vsyncpa [#allocation11], 1 }
  0x52   :  { %105 = vsyncpa [#allocation5], 1 }

</bundles_post_ra>
